<compile_context>
chip_gen: v6e
topology: v6e:2x2x1
jax: 0.10.0
libtpu: 0.0.40
codegen_flags: <defaults>
</compile_context>

<pallas_src>
import functools

import jax
import jax.numpy as jnp
from jax.experimental import pallas as pl
from jax.experimental.pallas import tpu as pltpu


def _round_up(x: int, m: int) -> int:
    return ((x + m - 1) // m) * m


def _confidence_loss_kernel(logits_ref, cols_ref, partial_ref, *,
                            true_b, gamma, eps=1e-12):
    pid = pl.program_id(0)
    tb, c = logits_ref.shape

    logits = logits_ref[...].astype(jnp.float32)          # (TB, C)
    cols = cols_ref[...]                                   # (TB, 8) f32
    l_t = cols[:, 0:1]                                     # logits[row, target]
    conf_logit = cols[:, 1:2]
    alpha_t = cols[:, 2:3]
    b = cols[:, 3:4]

    # softmax(logits)[target] only — single full-tile exp, two row reductions.
    row_max = jnp.max(logits, axis=1, keepdims=True)       # (TB, 1)
    denom = jnp.sum(jnp.exp(logits - row_max), axis=1, keepdims=True)
    p_target = jnp.exp(l_t - row_max) / denom              # (TB, 1)

    confidence = jax.nn.sigmoid(conf_logit)                # (TB, 1)
    conf = confidence * b + (1.0 - b)                      # (TB, 1)

    # q = predictions*conf + onehot*(1-conf), sum_c q == 1
    #   => softmax(log(q+eps))[target] = (q_t + eps) / (1 + C*eps)
    q_t = conf * p_target + (1.0 - conf)
    p_t = (q_t + eps) / (1.0 + c * eps)                    # (TB, 1)

    one_minus = 1.0 - p_t
    if float(gamma) == 2.0:
        focal_factor = one_minus * one_minus               # VPU square, not EUP pow
    elif float(gamma).is_integer():
        focal_factor = jax.lax.integer_pow(one_minus, int(gamma))
    else:
        focal_factor = one_minus ** gamma
    focal = -alpha_t * focal_factor * jnp.log(p_t + eps)   # (TB, 1)
    conf_nll = -jnp.log(confidence + eps)                  # (TB, 1)

    # Ragged last tile: out-of-bounds rows may hold garbage (NaN/inf possible),
    # so use where-masking (NaN in the unselected branch does not leak).
    row_ids = pid * tb + jax.lax.broadcasted_iota(jnp.int32, (tb, 1), 0)
    valid = row_ids < true_b
    focal_sum = jnp.sum(jnp.where(valid, focal, 0.0))
    conf_sum = jnp.sum(jnp.where(valid, conf_nll, 0.0))

    # Per-tile partials in a lane-dense block: lane 0 = focal, lane 1 = conf.
    lane = jax.lax.broadcasted_iota(jnp.int32, (1, 1, 128), 2)
    partial_ref[...] = jnp.where(lane == 0, focal_sum,
                                 jnp.where(lane == 1, conf_sum, 0.0))


def confidence_loss(logits, confidence_logit, targets, alpha, b, *,
                    lambda_confidence=0.1, gamma=2.0, beta=0.5,
                    reduction="mean", block_b=None,
                    vmem_limit_bytes=32 * 1024 * 1024):
    """logits: (B, C) f32/bf16, confidence_logit: (B, 1), targets: (B,) int
    labels, alpha: (C,) class weights, b: (B, 1) bernoulli mask."""
    B, C = logits.shape

    # Wrapper-side glue: O(B) gathers + a small packed (B, 8) side array.
    targets_i = targets.astype(jnp.int32).reshape(B, 1)
    l_t = jnp.take_along_axis(logits, targets_i, axis=1).astype(jnp.float32)
    conf_col = confidence_logit.reshape(B, 1).astype(jnp.float32)
    alpha_t = jnp.take(jnp.asarray(alpha, jnp.float32),
                       targets_i[:, 0]).reshape(B, 1)
    b_col = jnp.asarray(b, jnp.float32).reshape(B, 1)
    cols = jnp.concatenate(
        [l_t, conf_col, alpha_t, b_col, jnp.zeros((B, 4), jnp.float32)],
        axis=1)                                            # (B, 8)

    itemsize = jnp.dtype(logits.dtype).itemsize
    sub_mult = max(8, 32 // itemsize)                      # 8 f32, 16 bf16
    if block_b is None:
        # ~8 MiB per logits tile (double-buffered -> <=16 MiB + small columns),
        # comfortably under the explicit 32 MiB VMEM limit on all generations.
        budget_rows = (8 * 1024 * 1024) // max(1, itemsize * C)
        block_b = min(1024, max(sub_mult, budget_rows))
    tb = max(sub_mult, (int(block_b) // sub_mult) * sub_mult)
    tb = min(tb, _round_up(B, sub_mult))

    num_tiles = pl.cdiv(B, tb)

    kernel = functools.partial(
        _confidence_loss_kernel, true_b=int(B), gamma=float(gamma))

    partials = pl.pallas_call(
        kernel,
        out_shape=jax.ShapeDtypeStruct((num_tiles, 1, 128), jnp.float32),
        grid=(num_tiles,),
        in_specs=[
            pl.BlockSpec((tb, C), lambda i: (i, 0)),       # logits (native dtype)
            pl.BlockSpec((tb, 8), lambda i: (i, 0)),       # packed per-row columns
        ],
        out_specs=pl.BlockSpec((1, 1, 128), lambda i: (i, 0, 0)),
        compiler_params=pltpu.CompilerParams(
            dimension_semantics=("parallel",),             # megacore-friendly
            vmem_limit_bytes=int(vmem_limit_bytes)),
    )(logits, cols)

    # Tiny finalize in the wrapper (sum of per-tile partials, mean, lambda).
    focal_sum = jnp.sum(partials[:, 0, 0])
    conf_sum = jnp.sum(partials[:, 0, 1])
    if reduction == "mean":
        task_loss = focal_sum / float(B)
    else:
        task_loss = focal_sum
    # confidence_loss is always a mean (matches the PyTorch reference).
    confidence_loss_ = conf_sum / float(B)
    lam = jnp.where(confidence_loss_ > beta,
                    lambda_confidence / 0.95,
                    lambda_confidence / 1.05)
    return task_loss + lam * confidence_loss_


def _reference(logits, confidence_logit, targets, alpha, b,
               lambda_confidence=0.1, gamma=2.0, beta=0.5):
    # Pure-JAX reference mirroring the PyTorch forward (explicit log/exp
    # round-trip), for a sanity check.
    logits = logits.astype(jnp.float32)
    B, C = logits.shape
    predictions = jax.nn.softmax(logits, axis=1)
    confidence = jax.nn.sigmoid(confidence_logit).squeeze()
    onehot = jax.nn.one_hot(targets, C, dtype=jnp.float32)
    conf = confidence * b.squeeze() + (1.0 - b.squeeze())
    pred_new = predictions * conf[:, None] + onehot * (1.0 - conf[:, None])
    pred_new = jnp.log(pred_new + 1e-12)
    p2 = jax.nn.softmax(pred_new, axis=1)
    p_t = jnp.sum(onehot * p2, axis=1)
    alpha_t = jnp.sum(onehot * alpha[None, :], axis=1)
    focal = -alpha_t * (1.0 - p_t) ** gamma * jnp.log(p_t + 1e-12)
    task_loss = jnp.mean(focal)
    confidence_loss_ = jnp.mean(-jnp.log(confidence + 1e-12))
    lam = jnp.where(confidence_loss_ > beta,
                    lambda_confidence / 0.95, lambda_confidence / 1.05)
    return task_loss + lam * confidence_loss_


if __name__ == "__main__":
    key = jax.random.PRNGKey(0)

    def make_inputs(key, B, C):
        k_logits, k_conf, k_tgt, k_u, k_b = jax.random.split(key, 5)
        logits = jax.random.normal(k_logits, (B, C), dtype=jnp.float32)
        confidence_logit = jax.random.normal(k_conf, (B, 1), dtype=jnp.float32)
        targets = jax.random.randint(k_tgt, (B,), 0, C, dtype=jnp.int32)
        alpha = jnp.linspace(0.5, 1.5, C, dtype=jnp.float32)
        # b = Bernoulli(Uniform(0,1)) drawn deterministically outside the kernel
        u = jax.random.uniform(k_u, (B, 1), dtype=jnp.float32)
        b = (jax.random.uniform(k_b, (B, 1), dtype=jnp.float32) < u).astype(
            jnp.float32)
        return logits, confidence_logit, targets, alpha, b

    # 1) Small f32 case (B=8, C=16): single ragged tile.
    k1, k2 = jax.random.split(key)
    logits, conf_logit, targets, alpha, b = make_inputs(k1, 8, 16)
    loss = confidence_loss(logits, conf_logit, targets, alpha, b,
                           lambda_confidence=0.1, gamma=2.0, beta=0.5)
    loss = jax.block_until_ready(loss)
    ref = _reference(logits, conf_logit, targets, alpha, b)
    assert jnp.allclose(loss, ref, rtol=1e-5, atol=1e-5), (loss, ref)

    # 2) Multi-tile + ragged last tile (B=40, block_b=16 -> 3 tiles).
    logits2, conf_logit2, targets2, alpha2, b2 = make_inputs(k2, 40, 16)
    loss2 = confidence_loss(logits2, conf_logit2, targets2, alpha2, b2,
                            lambda_confidence=0.1, gamma=2.0, beta=0.5,
                            block_b=16)
    loss2 = jax.block_until_ready(loss2)
    ref2 = _reference(logits2, conf_logit2, targets2, alpha2, b2)
    assert jnp.allclose(loss2, ref2, rtol=1e-5, atol=1e-5), (loss2, ref2)

    # 3) bf16 logits path (no wrapper-side upcast of the big operand).
    logits_bf16 = logits.astype(jnp.bfloat16)
    loss3 = confidence_loss(logits_bf16, conf_logit, targets, alpha, b,
                            lambda_confidence=0.1, gamma=2.0, beta=0.5)
    loss3 = jax.block_until_ready(loss3)
    ref3 = _reference(logits_bf16, conf_logit, targets, alpha, b)
    assert jnp.allclose(loss3, ref3, rtol=1e-4, atol=1e-4), (loss3, ref3)

    print("KERNEL_OK")
</pallas_src>

<mosaic_0001>
module attributes {stable_mosaic.version = 11 : i64} {
  func.func @_confidence_loss_kernel(%arg0: i32, %arg1: memref<8x16xf32, #tpu.memory_space<vmem>>, %arg2: memref<8x8xf32, #tpu.memory_space<vmem>>, %arg3: memref<1x1x128xf32, #tpu.memory_space<vmem>>) attributes {dimension_semantics = [#tpu.dimension_semantics<parallel>], iteration_bounds = array<i64: 1>, scalar_prefetch = 0 : i64, scratch_operands = 0 : i64, tpu.core_type = #tpu.core_type<tc>, window_params = [{transform_indices = @transform_0, window_bounds = array<i64: 8, 16>}, {transform_indices = @transform_1, window_bounds = array<i64: 8, 8>}, {transform_indices = @transform_2, window_bounds = array<i64: 1, 1, 128>}]} {
    %c0 = arith.constant 0 : index
    %c0_0 = arith.constant 0 : index
    %0 = vector.load %arg1[%c0, %c0_0] : memref<8x16xf32, #tpu.memory_space<vmem>>, vector<8x16xf32>
    %c0_1 = arith.constant 0 : index
    %c0_2 = arith.constant 0 : index
    %1 = vector.load %arg2[%c0_1, %c0_2] : memref<8x8xf32, #tpu.memory_space<vmem>>, vector<8x8xf32>
    %2 = vector.extract_strided_slice %1 {offsets = [0, 0], sizes = [8, 1], strides = [1, 1]} : vector<8x8xf32> to vector<8x1xf32>
    %3 = vector.extract_strided_slice %1 {offsets = [0, 1], sizes = [8, 1], strides = [1, 1]} : vector<8x8xf32> to vector<8x1xf32>
    %4 = vector.extract_strided_slice %1 {offsets = [0, 2], sizes = [8, 1], strides = [1, 1]} : vector<8x8xf32> to vector<8x1xf32>
    %5 = vector.extract_strided_slice %1 {offsets = [0, 3], sizes = [8, 1], strides = [1, 1]} : vector<8x8xf32> to vector<8x1xf32>
    %cst = arith.constant dense<0xFF800000> : vector<8xf32>
    %6 = vector.multi_reduction <maximumf>, %0, %cst [1] : vector<8x16xf32> to vector<8xf32>
    %7 = vector.shape_cast %6 : vector<8xf32> to vector<8x1xf32>
    %8 = vector.broadcast %7 : vector<8x1xf32> to vector<8x16xf32>
    %9 = arith.subf %0, %8 : vector<8x16xf32>
    %10 = math.exp %9 : vector<8x16xf32>
    %cst_3 = arith.constant dense<0.000000e+00> : vector<8xf32>
    %11 = vector.multi_reduction <add>, %10, %cst_3 [1] : vector<8x16xf32> to vector<8xf32>
    %12 = vector.shape_cast %11 : vector<8xf32> to vector<8x1xf32>
    %13 = arith.subf %2, %7 : vector<8x1xf32>
    %14 = math.exp %13 : vector<8x1xf32>
    %15 = arith.divf %14, %12 : vector<8x1xf32>
    %16 = arith.negf %3 : vector<8x1xf32>
    %17 = math.exp %16 : vector<8x1xf32>
    %cst_4 = arith.constant 1.000000e+00 : f32
    %18 = vector.broadcast %cst_4 : f32 to vector<8x1xf32>
    %19 = arith.addf %18, %17 : vector<8x1xf32>
    %20 = arith.divf %18, %19 : vector<8x1xf32>
    %21 = arith.mulf %20, %5 : vector<8x1xf32>
    %cst_5 = arith.constant 1.000000e+00 : f32
    %22 = vector.broadcast %cst_5 : f32 to vector<8x1xf32>
    %23 = arith.subf %22, %5 : vector<8x1xf32>
    %24 = arith.addf %21, %23 : vector<8x1xf32>
    %25 = arith.mulf %24, %15 : vector<8x1xf32>
    %cst_6 = arith.constant 1.000000e+00 : f32
    %26 = vector.broadcast %cst_6 : f32 to vector<8x1xf32>
    %27 = arith.subf %26, %24 : vector<8x1xf32>
    %28 = arith.addf %25, %27 : vector<8x1xf32>
    %cst_7 = arith.constant 9.99999996E-13 : f32
    %29 = vector.broadcast %cst_7 : f32 to vector<8x1xf32>
    %30 = arith.addf %28, %29 : vector<8x1xf32>
    %cst_8 = arith.constant 1.000000e+00 : f32
    %31 = vector.broadcast %cst_8 : f32 to vector<8x1xf32>
    %32 = arith.divf %30, %31 : vector<8x1xf32>
    %cst_9 = arith.constant 1.000000e+00 : f32
    %33 = vector.broadcast %cst_9 : f32 to vector<8x1xf32>
    %34 = arith.subf %33, %32 : vector<8x1xf32>
    %35 = arith.mulf %34, %34 : vector<8x1xf32>
    %cst_10 = arith.constant 0.000000e+00 : f32
    %36 = vector.broadcast %cst_10 : f32 to vector<8x1xf32>
    %37 = arith.subf %36, %4 : vector<8x1xf32>
    %38 = arith.mulf %37, %35 : vector<8x1xf32>
    %cst_11 = arith.constant 9.99999996E-13 : f32
    %39 = vector.broadcast %cst_11 : f32 to vector<8x1xf32>
    %40 = arith.addf %32, %39 : vector<8x1xf32>
    %41 = math.log %40 : vector<8x1xf32>
    %42 = arith.mulf %38, %41 : vector<8x1xf32>
    %cst_12 = arith.constant 9.99999996E-13 : f32
    %43 = vector.broadcast %cst_12 : f32 to vector<8x1xf32>
    %44 = arith.addf %20, %43 : vector<8x1xf32>
    %45 = math.log %44 : vector<8x1xf32>
    %cst_13 = arith.constant 0.000000e+00 : f32
    %46 = vector.broadcast %cst_13 : f32 to vector<8x1xf32>
    %47 = arith.subf %46, %45 : vector<8x1xf32>
    %c8_i32 = arith.constant 8 : i32
    %48 = arith.muli %arg0, %c8_i32 : i32
    %49 = tpu.iota {dimensions = array<i32: 0>} : vector<8x1xi32>
    %50 = vector.broadcast %48 : i32 to vector<8x1xi32>
    %51 = arith.addi %50, %49 : vector<8x1xi32>
    %c8_i32_14 = arith.constant 8 : i32
    %52 = vector.broadcast %c8_i32_14 : i32 to vector<8x1xi32>
    %53 = arith.cmpi slt, %51, %52 : vector<8x1xi32>
    %cst_15 = arith.constant 0.000000e+00 : f32
    %54 = vector.broadcast %cst_15 : f32 to vector<8x1xf32>
    %55 = arith.select %53, %42, %54 : vector<8x1xi1>, vector<8x1xf32>
    %56 = vector.shape_cast %55 : vector<8x1xf32> to vector<1x8x1xf32>
    %cst_16 = arith.constant dense<0.000000e+00> : vector<1xf32>
    %57 = vector.multi_reduction <add>, %56, %cst_16 [1, 2] : vector<1x8x1xf32> to vector<1xf32>
    %58 = vector.shape_cast %57 : vector<1xf32> to vector<1x1x1xf32>
    %59 = vector.extract %58[0, 0, 0] : f32 from vector<1x1x1xf32>
    %cst_17 = arith.constant 0.000000e+00 : f32
    %60 = vector.broadcast %cst_17 : f32 to vector<8x1xf32>
    %61 = arith.select %53, %47, %60 : vector<8x1xi1>, vector<8x1xf32>
    %62 = vector.shape_cast %61 : vector<8x1xf32> to vector<1x8x1xf32>
    %cst_18 = arith.constant dense<0.000000e+00> : vector<1xf32>
    %63 = vector.multi_reduction <add>, %62, %cst_18 [1, 2] : vector<1x8x1xf32> to vector<1xf32>
    %64 = vector.shape_cast %63 : vector<1xf32> to vector<1x1x1xf32>
    %65 = vector.extract %64[0, 0, 0] : f32 from vector<1x1x1xf32>
    %66 = tpu.iota {dimensions = array<i32: 2>} : vector<1x1x128xi32>
    %c0_i32 = arith.constant 0 : i32
    %67 = vector.broadcast %c0_i32 : i32 to vector<1x1x128xi32>
    %68 = arith.cmpi eq, %66, %67 : vector<1x1x128xi32>
    %c1_i32 = arith.constant 1 : i32
    %69 = vector.broadcast %c1_i32 : i32 to vector<1x1x128xi32>
    %70 = arith.cmpi eq, %66, %69 : vector<1x1x128xi32>
    %cst_19 = arith.constant 0.000000e+00 : f32
    %71 = vector.broadcast %65 : f32 to vector<1x1x128xf32>
    %72 = vector.broadcast %cst_19 : f32 to vector<1x1x128xf32>
    %73 = arith.select %70, %71, %72 : vector<1x1x128xi1>, vector<1x1x128xf32>
    %74 = vector.broadcast %59 : f32 to vector<1x1x128xf32>
    %75 = arith.select %68, %74, %73 : vector<1x1x128xi1>, vector<1x1x128xf32>
    %c0_20 = arith.constant 0 : index
    %c0_21 = arith.constant 0 : index
    %c0_22 = arith.constant 0 : index
    %76 = vector.load %arg3[%c0_20, %c0_21, %c0_22] : memref<1x1x128xf32, #tpu.memory_space<vmem>>, vector<1x1x128xf32>
    tpu.vector_store %arg3[%c0_20, %c0_21, %c0_22], %75 {strides = array<i32>} : memref<1x1x128xf32, #tpu.memory_space<vmem>>, vector<1x1x128xf32>,
    return
  }
  func.func @transform_0(%arg0: i32) -> (i32, i32) {
    %c0_i32 = arith.constant 0 : i32
    %c0_i32_0 = arith.constant 0 : i32
    return %arg0, %c0_i32 : i32, i32
  }
  func.func @transform_1(%arg0: i32) -> (i32, i32) {
    %c0_i32 = arith.constant 0 : i32
    %c0_i32_0 = arith.constant 0 : i32
    return %arg0, %c0_i32 : i32, i32
  }
  func.func @transform_2(%arg0: i32) -> (i32, i32, i32) {
    %c0_i32 = arith.constant 0 : i32
    %c0_i32_0 = arith.constant 0 : i32
    %c0_i32_1 = arith.constant 0 : i32
    return %arg0, %c0_i32, %c0_i32_0 : i32, i32, i32
  }
}

</mosaic_0001>

<bundles_post_ra>
// kernel: tpu_custom_call.1
= control target key start
LH: loop header
LB: loop body
LE: loop exit
PB: predicated region body
PF: predicated region fallthrough
CT: control target
= control target key end

     0   :  { %7 = vsyncpa [#allocation3], 0  ;;  %s284_s0 = inlined_call_operand.hbm [shape: f32[8,16], index: 0, kind: input, shape index: {}]   ;;  %s285_s1 = inlined_call_operand.hbm [shape: f32[8,8], index: 1, kind: input, shape index: {}]   ;;  %s286_s2 = inlined_call_operand.hbm [shape: f32[1,1,128], index: 2, kind: output, shape index: {}]  }
   0x1   :  { %8 = vsyncpa [#allocation6], 0 }
   0x2   :  { %9 = vsyncpa [#allocation4], 0  ;;  %s251_s9 = smov [#allocation2]   ;;  %s252_s11 = smov [#allocation5]  }
   0x3   :  { %s16_s10 = sshll.u32 %s251_s9, 4  ;;  %s26_s12 = sshll.u32 %s252_s11, 4  ;;  %s17_s10 = int_to_ptr.vmem [resolvable:$true] %s16_s10  ;;  %s27_s12 = int_to_ptr.vmem [resolvable:$true] %s26_s12 }
   0x4   :  { %s193_s13 = scalar_lea.vmem %s17_s10, 128  ;;  %p198_p1 = scmp.lt.s32.totalorder %s17_s10, %s17_s10 }
   0x5   :  { %p194_p0 = scmp.ne.s32.totalorder %s17_s10, %s193_s13  ;;  %p199_p2 = scmp.lt.s32.totalorder %s193_s13, %s193_s13 }
   0x7   :  { %p200_p3 = por %p199_p2, %p198_p1 }
   0x9   :  { %p201_p4 = pnand %p200_p3, %p194_p0 }
   0xb   :  { %204 = shalt.err (!%p201_p4)
}
   0xc   :  { %19 = dma.hbm_to_vmem [thread:$0]  %s284_s0, 128, %s17_s10, [#allocation3]  }
   0xd   :  { %s213_s16 = scalar_lea.vmem %s27_s12, 128  ;;  %p218_p6 = scmp.lt.s32.totalorder %s27_s12, %s27_s12 }
   0xe   :  { %p214_p5 = scmp.ne.s32.totalorder %s27_s12, %s213_s16  ;;  %p219_p7 = scmp.lt.s32.totalorder %s213_s16, %s213_s16 }
  0x10   :  { %p220_p8 = por %p219_p7, %p218_p6 }
  0x12   :  { %p221_p9 = pnand %p220_p8, %p214_p5 }
  0x14   :  { %224 = shalt.err (!%p221_p9)
}
  0x15   :  { %29 = dma.hbm_to_vmem [thread:$0]  %s285_s1, 128, %s27_s12, [#allocation6]  }
  0x16   :  { %245 = dma.done.wait [#allocation3], 128  }
  0x17   :  { %246 = vsyncadd [#allocation3], 4294967168 }
  0x18   :  { %247 = dma.done.wait [#allocation6], 128  }
  0x19   :  { %248 = vsyncadd [#allocation6], 4294967168  ;;  %vm38_vm0 = vcmask 130048   ;;  %v36_v0 = vld [vmem:[#allocation2] sm:$0xff]  ;;  %v37_v7 = vld [vmem:[#allocation5] sm:$0xff]  ;;  %s253_s0 = smov 126   ;;  %v135_v60 = vlaneseq }
  0x1a   :  { %v39_v1 = vsel %vm38_vm0, %v36_v0, -inf  ;;  %60 = vrot.lane.b32.xlu1 %v37_v7, %s253_s0  ;;  %v64_v8 = vsub.f32 1.0, %v37_v7  ;;  %s254_s1 = smov 1   ;;  %v160_v15 = vmul.f32 -1.442695, %v37_v7  ;;  %v80_v34 = vsub.f32 0.0, %v37_v7 }
  0x1b   :  { %40 = vmax.xlane.f32.xlu0 %v39_v1  ;;  %s255_s19 = smov 127   ;;  %vm109_vm1 = vcmask 7168   ;;  %v136_v61 = vand.u32 127, %v135_v60  ;;  %s256_s21 = smov [#allocation7]  }
  0x1c   :  { %s150_s22 = sshll.u32 %s256_s21, 4  ;;  %s151_s22 = int_to_ptr.vmem [resolvable:$true] %s150_s22 }
  0x1d   :  { %vm138_vm2 = vcmp.eq.s32.totalorder %v136_v61, 1  ;;  %vm137_vm3 = vcmp.eq.s32.totalorder %v136_v61, 0  ;;  %s225_s24 = scalar_lea.vmem %s151_s22, 16  ;;  %s229_s25 = scalar_lea.vmem %s151_s22, 32 }
  0x1e   :  { %66 = vrot.lane.b32.xlu1 %v64_v8, %s253_s0  ;;  %p226_p10 = scmp.ne.s32.totalorder %s151_s22, %s225_s24  ;;  %p230_p11 = scmp.lt.s32.totalorder %s151_s22, %s151_s22 }
  0x1f   :  { %p231_p12 = scmp.lt.s32.totalorder %s229_s25, %s225_s24 }
  0x21   :  { %p232_p13 = por %p231_p12, %p230_p11 }
  0x23   :  { %p233_p0 = pnand %p232_p13, %p226_p10 }
  0x8c   :  { %v61_v18 = vpop.permute.xlu1 %60 }
  0x90   :  { %v67_v21 = vpop.permute.xlu1 %66 }
  0xa4   :  { %v41_v2 = vpop.xlane.xlu0 %40 }
  0xa5   :  { %v42_v3 = vsub.f32 %v36_v0, %v41_v2  ;;  %v48_v9 = vsub.f32 %v37_v7, %v41_v2 }
  0xa7   :  { %v43_v4 = vmul.f32 1.442695, %v42_v3  ;;  %v49_v10 = vmul.f32 1.442695, %v48_v9 }
  0xa9   :  { %171 = vpow2.f32 %v43_v4 }
  0xaa   :  { %173 = vpow2.f32 %v49_v10 }
  0xb6   :  { %v172_v5 = vpop.eup %171 }
  0xb7   :  { %v45_v6 = vsel %vm38_vm0, %v172_v5, 0.0  ;;  %v174_v12 = vpop.eup %173 }
  0xb8   :  { %46 = vadd.xlane.f32.xlu0 %v45_v6 }
 0x141   :  { %v47_v11 = vpop.xlane.xlu0 %46 }
 0x142   :  { %175 = vrcp.f32 %v47_v11 }
 0x143   :  { %177 = vpow2.f32 %v160_v15 }
 0x14f   :  { %v176_v13 = vpop.eup %175 }
 0x150   :  { %v52_v14 = vmul.f32 %v176_v13, %v174_v12  ;;  %v178_v16 = vpop.eup %177 }
 0x151   :  { %v56_v17 = vadd.f32 1.0, %v178_v16 }
 0x152   :  { %71 = vrot.lane.b32.xlu0 %v52_v14, %s254_s1 }
 0x153   :  { %179 = vrcp.f32 %v56_v17 }
 0x160   :  { %v180_v19 = vpop.eup %179 }
 0x161   :  { %v63_v20 = vmul.f32 %v180_v19, %v61_v18  ;;  %v94_v33 = vadd.f32 1e-12, %v180_v19 }
 0x163   :  { %v69_v22 = vadd.f32 %v67_v21, %v63_v20 }
 0x165   :  { %v75_v24 = vsub.f32 1.0, %v69_v22 }
 0x1c4   :  { %v72_v23 = vpop.permute.xlu0 %71 }
 0x1c5   :  { %v74_v25 = vmul.f32 %v72_v23, %v69_v22 }
 0x1c7   :  { %v76_v26 = vadd.f32 %v75_v24, %v74_v25 }
 0x1c9   :  { %v77_v27 = vadd.f32 1e-12, %v76_v26 }
 0x1cb   :  { %v86_v28 = vadd.f32 1e-12, %v77_v27  ;;  %v78_v29 = vsub.f32 1.0, %v77_v27 }
 0x1cd   :  { %181 = vlog2.f32 %v86_v28  ;;  %v79_v30 = vmul.f32 %v78_v29, %v78_v29 }
 0x1ce   :  { %183 = vlog2.f32 %v94_v33 }
 0x1cf   :  { %82 = vrot.lane.b32.xlu1 %v79_v30, %s254_s1 }
 0x1da   :  { %v182_v31 = vpop.eup %181 }
 0x1db   :  { %v88_v32 = vmul.f32 0.6931472, %v182_v31  ;;  %v184_v35 = vpop.eup %183 }
 0x1dc   :  { %v96_v38 = vmul.f32 0.6931472, %v184_v35 }
 0x1dd   :  { %90 = vrot.lane.b32.xlu1 %v88_v32, %s254_s1 }
 0x1de   :  { %v97_v41 = vsub.f32 0.0, %v96_v38 }
 0x241   :  { %v83_v36 = vpop.permute.xlu1 %82 }
 0x242   :  { %v85_v37 = vmul.f32 %v83_v36, %v80_v34 }
 0x24f   :  { %v91_v39 = vpop.permute.xlu1 %90 }
 0x250   :  { %v93_v40 = vmul.f32 %v91_v39, %v85_v37 }
 0x252   :  { %106 = vrot.lane.b32.xlu1 %v93_v40, %s253_s0 }
 0x256   :  { %122 = vrot.lane.b32.xlu1 %v97_v41, %s255_s19 }
 0x2c4   :  { %v107_v42 = vpop.permute.xlu1 %106 }
 0x2c5   :  { %v110_v43 = vsel %vm109_vm1, %v107_v42, 0.0 }
 0x2c6   :  { %111 = vadd.xlane.f32.xlu1 %v110_v43 }
 0x2c8   :  { %v123_v44 = vpop.permute.xlu1 %122 }
 0x2c9   :  { %v125_v45 = vsel %vm109_vm1, %v123_v44, 0.0 }
 0x2ca   :  { %126 = vadd.xlane.f32.xlu0 %v125_v45 }
 0x34f   :  { %v112_v46 = vpop.xlane.xlu1 %111 }
 0x350   :  { %v113_v47 = vrot.slane %v112_v46, 4 }
 0x352   :  { %v114_v48 = vadd.f32 %v113_v47, %v112_v46 }
 0x353   :  { %v127_v49 = vpop.xlane.xlu0 %126 }
 0x354   :  { %v115_v50 = vrot.slane %v114_v48, 2  ;;  %v128_v51 = vrot.slane %v127_v49, 4 }
 0x356   :  { %v129_v52 = vadd.f32 %v128_v51, %v127_v49  ;;  %v116_v53 = vadd.f32 %v115_v50, %v114_v48 }
 0x358   :  { %v130_v54 = vrot.slane %v129_v52, 2  ;;  %v117_v55 = vrot.slane %v116_v53, 1 }
 0x35a   :  { %v131_v56 = vadd.f32 %v130_v54, %v129_v52  ;;  %v118_v57 = vadd.f32 %v117_v55, %v116_v53 }
 0x35c   :  { %161 = vpush %v118_v57  ;;  %v132_v58 = vrot.slane %v131_v56, 1 }
 0x35e   :  { %v133_v59 = vadd.f32 %v132_v58, %v131_v56 }
 0x360   :  { %163 = vpush %v133_v59 }
 0x38d   :  { %s162_s20 = spop %161 }
 0x38e   :  { %v141_v63 = vstv %s162_s20 }
 0x391   :  { %s164_s23 = spop %163 }
 0x392   :  { %v139_v62 = vstv %s164_s23 }
 0x393   :  { %v140_v0 = vsel %vm138_vm2, %v139_v62, 0.0 }
 0x394   :  { %v142_v1 = vsel %vm137_vm3, %v141_v63, %v140_v0 }
 0x395   :  { %143 = vst [vmem:[#allocation7] sm:$0x1] %v142_v1 }
 0x396   :  { %236 = shalt.err (!%p233_p0)
}
 0x397   :  { %153 = dma.vmem_to_hbm [thread:$0]  %s151_s22, 16, %s286_s2, [#allocation4]  }
 0x398   :  { %249 = dma.done.wait [#allocation4], 16  }
 0x399   :  { %250 = vsyncadd [#allocation4], 4294967280 }
 0x39a   :  { %157 = vsyncpa [#allocation3], 1 }
 0x39b   :  { %158 = vsyncpa [#allocation6], 1 }
 0x39c   :  { %159 = vsyncpa [#allocation4], 1 }

</bundles_post_ra>
